<compile_context>
chip_gen: v6e
topology: v6e:2x2x1
jax: 0.10.0
libtpu: 0.0.40
codegen_flags: <defaults>
</compile_context>

<pallas_src>
import jax
import jax.numpy as jnp
from jax.experimental import pallas as pl
from jax.experimental.pallas import tpu as pltpu


def _shift_kernel(x_ref, b_ref, out_ref):
    # x_ref: (TB, D)   b_ref: (1, D) -> broadcasts over the sublane (batch) axis.
    out_ref[...] = x_ref[...] + b_ref[...]


def _pick_batch_tile(B, D, itemsize):
    """Largest batch tile that keeps double-buffered in+out blocks well under VMEM."""
    if B <= 8:
        return B  # full-extent block, no (8,128) divisibility requirement.
    # Budget ~8 MiB for (x block + out block) * 2 buffers -> 2 MiB per block.
    budget_bytes = 2 * 1024 * 1024
    rows = max(8, budget_bytes // max(1, D * itemsize))
    rows = (rows // 8) * 8          # multiple of 8 sublanes
    rows = min(rows, 4096)          # keep per-step DMA sizes sane
    if rows >= B:
        return B
    return rows


def _shift_pallas(x, b):
    """out = x + b  (b broadcast over the batch axis)."""
    B, D = x.shape
    dtype = x.dtype
    itemsize = jnp.dtype(dtype).itemsize

    # Normalize b to a (1, D) row in the input dtype (handles scalar or (D,)).
    b_row = jnp.broadcast_to(jnp.asarray(b, dtype).reshape(1, -1), (1, D))

    TB = _pick_batch_tile(B, D, itemsize)
    grid = (pl.cdiv(B, TB),)

    cost = pl.CostEstimate(
        flops=B * D,
        transcendentals=0,
        bytes_accessed=(2 * B * D + D) * itemsize,
    )

    return pl.pallas_call(
        _shift_kernel,
        out_shape=jax.ShapeDtypeStruct((B, D), dtype),
        grid=grid,
        in_specs=[
            pl.BlockSpec((TB, D), lambda i: (i, 0)),   # input: tiled over batch
            pl.BlockSpec((1, D), lambda i: (0, 0)),    # b: resident across steps
        ],
        out_specs=pl.BlockSpec((TB, D), lambda i: (i, 0)),
        compiler_params=pltpu.CompilerParams(
            dimension_semantics=("parallel",),
        ),
        cost_estimate=cost,
    )(x, b_row)


def shift_forward(inputs, b):
    """Pallas implementation of Shift(b).forward.

    inputs = (input, logdet) or (input, logdet, context), input: (B, D).
    Returns the same tuple structure with input shifted by b.
    """
    if len(inputs) == 2:
        x, logdet = inputs
        return (_shift_pallas(x, b), logdet)
    elif len(inputs) == 3:
        x, logdet, context = inputs
        return (_shift_pallas(x, b), logdet, context)
    else:
        raise Exception('inputs length not correct')


def _reference(inputs, b):
    """Pure-JAX reference of Shift.forward (for validation)."""
    if len(inputs) == 2:
        x, logdet = inputs
        return (x + b, logdet)
    x, logdet, context = inputs
    return (x + b, logdet, context)


if __name__ == "__main__":
    # Small shapes consistent with BaseFlow.sample: (n, dim) samples, per-sample
    # logdet, (n, context_dim) context.  D=128 keeps the feature axis lane-dense.
    B, D, context_dim = 16, 128, 8

    key = jax.random.PRNGKey(0)
    k_x, k_b, k_ctx = jax.random.split(key, 3)

    x = jax.random.normal(k_x, (B, D), jnp.float32)
    logdet = jnp.zeros((B,), jnp.float32)
    context = jax.random.normal(k_ctx, (B, context_dim), jnp.float32)
    b = jax.random.normal(k_b, (D,), jnp.float32)  # per-feature shift

    inputs = (x, logdet, context)

    out_x, out_logdet, out_ctx = shift_forward(inputs, b)
    jax.block_until_ready(out_x)

    ref_x, ref_logdet, ref_ctx = _reference(inputs, b)
    assert out_x.shape == (B, D)
    assert jnp.allclose(out_x, ref_x, rtol=1e-6, atol=1e-6), "mismatch vs reference"
    assert jnp.array_equal(out_logdet, ref_logdet)
    assert jnp.array_equal(out_ctx, ref_ctx)

    # Also exercise the 2-tuple (input, logdet) path with a scalar shift.
    out2_x, out2_logdet = shift_forward((x, logdet), 0.5)
    jax.block_until_ready(out2_x)
    assert jnp.allclose(out2_x, x + 0.5, rtol=1e-6, atol=1e-6)
    assert jnp.array_equal(out2_logdet, logdet)

    # Larger batch to exercise the tiled (multi-step grid) path.
    Bb = 3000  # not a multiple of the tile -> trailing partial block
    xb = jax.random.normal(k_x, (Bb, D), jnp.float32)
    outb, _ = shift_forward((xb, jnp.zeros((Bb,), jnp.float32)), b)
    jax.block_until_ready(outb)
    assert jnp.allclose(outb, xb + b, rtol=1e-6, atol=1e-6)

    print("KERNEL_OK")
</pallas_src>

<mosaic_0001>
module attributes {stable_mosaic.version = 11 : i64} {
  func.func @_shift_kernel(%arg0: i32, %arg1: memref<16x128xf32, #tpu.memory_space<vmem>>, %arg2: memref<1x128xf32, #tpu.memory_space<vmem>>, %arg3: memref<16x128xf32, #tpu.memory_space<vmem>>) attributes {dimension_semantics = [#tpu.dimension_semantics<parallel>], iteration_bounds = array<i64: 1>, scalar_prefetch = 0 : i64, scratch_operands = 0 : i64, tpu.core_type = #tpu.core_type<tc>, window_params = [{transform_indices = @transform_0, window_bounds = array<i64: 16, 128>}, {pipeline_mode = #tpu.pipeline_mode<synchronous>, transform_indices = @transform_1, window_bounds = array<i64: 1, 128>}, {transform_indices = @transform_2, window_bounds = array<i64: 16, 128>}]} {
    %c0 = arith.constant 0 : index
    %c0_0 = arith.constant 0 : index
    %0 = vector.load %arg1[%c0, %c0_0] : memref<16x128xf32, #tpu.memory_space<vmem>>, vector<16x128xf32>
    %c0_1 = arith.constant 0 : index
    %c0_2 = arith.constant 0 : index
    %1 = vector.load %arg2[%c0_1, %c0_2] : memref<1x128xf32, #tpu.memory_space<vmem>>, vector<1x128xf32>
    %2 = vector.broadcast %1 : vector<1x128xf32> to vector<16x128xf32>
    %3 = arith.addf %0, %2 : vector<16x128xf32>
    %c0_3 = arith.constant 0 : index
    %c0_4 = arith.constant 0 : index
    %4 = vector.load %arg3[%c0_3, %c0_4] : memref<16x128xf32, #tpu.memory_space<vmem>>, vector<16x128xf32>
    tpu.vector_store %arg3[%c0_3, %c0_4], %3 {strides = array<i32>} : memref<16x128xf32, #tpu.memory_space<vmem>>, vector<16x128xf32>,
    return
  }
  func.func @transform_0(%arg0: i32) -> (i32, i32) {
    %c0_i32 = arith.constant 0 : i32
    %c0_i32_0 = arith.constant 0 : i32
    return %arg0, %c0_i32 : i32, i32
  }
  func.func @transform_1(%arg0: i32) -> (i32, i32) {
    %c0_i32 = arith.constant 0 : i32
    %c0_i32_0 = arith.constant 0 : i32
    %c0_i32_1 = arith.constant 0 : i32
    return %c0_i32, %c0_i32_0 : i32, i32
  }
  func.func @transform_2(%arg0: i32) -> (i32, i32) {
    %c0_i32 = arith.constant 0 : i32
    %c0_i32_0 = arith.constant 0 : i32
    return %arg0, %c0_i32 : i32, i32
  }
}

</mosaic_0001>

<bundles_post_ra>
// kernel: tpu_custom_call.1
= control target key start
LH: loop header
LB: loop body
LE: loop exit
PB: predicated region body
PF: predicated region fallthrough
CT: control target
= control target key end

     0   :  { %7 = vsyncpa [#allocation3], 0  ;;  %s133_s0 = inlined_call_operand.hbm [shape: f32[16,128], index: 0, kind: input, shape index: {}]   ;;  %s134_s1 = inlined_call_operand.vmem [shape: f32[1,128], index: 1, kind: input, shape index: {}]   ;;  %s135_s2 = inlined_call_operand.hbm [shape: f32[16,128], index: 2, kind: output, shape index: {}]  }
   0x1   :  { %8 = vsyncpa [#allocation4], 0  ;;  %s105_s9 = smov [#allocation2]  }
   0x2   :  { %s14_s10 = sshll.u32 %s105_s9, 4  ;;  %s15_s10 = int_to_ptr.vmem [resolvable:$true] %s14_s10 }
   0x3   :  { %s69_s11 = scalar_lea.vmem %s15_s10, 256  ;;  %p74_p1 = scmp.lt.s32.totalorder %s15_s10, %s15_s10 }
   0x4   :  { %p70_p0 = scmp.ne.s32.totalorder %s15_s10, %s69_s11  ;;  %p75_p2 = scmp.lt.s32.totalorder %s69_s11, %s69_s11 }
   0x6   :  { %p76_p3 = por %p75_p2, %p74_p1 }
   0x8   :  { %p77_p4 = pnand %p76_p3, %p70_p0 }
   0xa   :  { %80 = shalt.err (!%p77_p4)
}
   0xb   :  { %s106_s12 = smov 128   ;;  %s107_s13 = smov 8  }
   0xc   :  { %20 = dma.hbm_to_vmem [thread:$0]  %s133_s0, 256, %s15_s10, [#allocation3], %s106_s12, %s106_s12, %s107_s13  }
   0xd   :  { %101 = dma.done.wait [#allocation3], 256  }
   0xe   :  { %102 = vsyncadd [#allocation3], 4294967040  ;;  %s108_s16 = smov [#allocation5]   ;;  %v26_v0 = vld [vmem:[#allocation2] sm:$0xff]  ;;  %v27_v2 = vld [vmem:[#allocation2 + $0x8] sm:$0xff] }
   0xf   :  { %s44_s17 = sshll.u32 %s108_s16, 4  ;;  %v56_v1 = vld [vmem:[%s134_s1] ss:$0 sm:$0xff]  ;;  %s45_s17 = int_to_ptr.vmem [resolvable:$true] %s44_s17 }
  0x10   :  { %v35_v3 = vadd.f32 %v56_v1, %v26_v0  ;;  %v36_v4 = vadd.f32 %v56_v1, %v27_v2  ;;  %s81_s20 = scalar_lea.vmem %s45_s17, 256  ;;  %p86_p6 = scmp.lt.s32.totalorder %s45_s17, %s45_s17 }
  0x11   :  { %p82_p5 = scmp.ne.s32.totalorder %s45_s17, %s81_s20  ;;  %p87_p7 = scmp.lt.s32.totalorder %s81_s20, %s81_s20 }
  0x12   :  { %37 = vst [vmem:[#allocation5] sm:$0xff] %v35_v3  ;;  %38 = vst [vmem:[#allocation5 + $0x8] sm:$0xff] %v36_v4 }
  0x13   :  { %p88_p8 = por %p87_p7, %p86_p6 }
  0x15   :  { %p89_p9 = pnand %p88_p8, %p82_p5 }
  0x17   :  { %92 = shalt.err (!%p89_p9)
}
  0x18   :  { %50 = dma.vmem_to_hbm [thread:$0]  %s45_s17, 256, %s135_s2, [#allocation4], %s106_s12, %s106_s12, %s107_s13  }
  0x19   :  { %103 = dma.done.wait [#allocation4], 256  }
  0x1a   :  { %104 = vsyncadd [#allocation4], 4294967040 }
  0x1b   :  { %54 = vsyncpa [#allocation3], 1 }
  0x1c   :  { %55 = vsyncpa [#allocation4], 1 }

</bundles_post_ra>
